<compile_context>
chip_gen: v7x
topology: tpu7x:2x2x1
jax: 0.10.0
libtpu: 0.0.40
codegen_flags: <defaults>
</compile_context>

<pallas_src>
import functools

import jax
import jax.numpy as jnp
from jax.experimental import pallas as pl
from jax.experimental.pallas import tpu as pltpu


def _make_fused_textcnn_call(B, T, E, Nf, Ks, C):
    """Single pallas_call: relu(maxpool(conv_k(x))) for all k, concat, then FC."""
    n_convs = len(Ks)

    def kernel(*refs):
        # refs = [x, (w_k, b_k) * n_convs, w_fc, b_fc, out]
        x_ref = refs[0]
        conv_refs = refs[1:1 + 2 * n_convs]
        wfc_ref, bfc_ref, o_ref = refs[1 + 2 * n_convs:]

        x = x_ref[...]                                   # (B, T, E)
        pooled = []
        for idx, k in enumerate(Ks):                     # Ks is tiny & static -> unrolled
            w_ref = conv_refs[2 * idx]                   # (k*E, Nf)  tap-major rows
            b_ref = conv_refs[2 * idx + 1]               # (1, Nf)
            L = T - k + 1
            # im2col along lanes: cols[b, l, t*E + e] = x[b, l+t, e]
            cols = jnp.concatenate(
                [x[:, t:t + L, :] for t in range(k)], axis=-1)   # (B, L, k*E)
            acc = jax.lax.dot_general(                   # one deep-K MXU push
                cols, w_ref[...],
                dimension_numbers=(((2,), (0,)), ((), ())),
                preferred_element_type=jnp.float32)      # (B, L, Nf)
            # bias after pool (exact: bias constant over pooled axis), then relu
            p = jnp.max(acc, axis=1) + b_ref[...]        # (B, Nf)
            pooled.append(jnp.maximum(p, 0.0))
        z = jnp.concatenate(pooled, axis=-1)             # (B, n_convs*Nf), vreg-resident
        o_ref[...] = (
            jnp.dot(z, wfc_ref[...], preferred_element_type=jnp.float32)
            + bfc_ref[...]
        )

    in_specs = [pl.BlockSpec((B, T, E), lambda i: (0, 0, 0))]
    for k in Ks:
        in_specs.append(pl.BlockSpec((k * E, Nf), lambda i: (0, 0)))
        in_specs.append(pl.BlockSpec((1, Nf), lambda i: (0, 0)))
    in_specs.append(pl.BlockSpec((n_convs * Nf, C), lambda i: (0, 0)))
    in_specs.append(pl.BlockSpec((1, C), lambda i: (0, 0)))

    return pl.pallas_call(
        kernel,
        out_shape=jax.ShapeDtypeStruct((B, C), jnp.float32),
        grid=(1,),
        in_specs=in_specs,
        out_specs=pl.BlockSpec((B, C), lambda i: (0, 0)),
        compiler_params=pltpu.CompilerParams(
            dimension_semantics=("arbitrary",)),
    )


def init_params(key, E, Nf, Ks, C):
    """Deterministic init with PyTorch-native shapes, re-laid-out for the kernel."""
    params = {"convs": [], "fc": None}
    for k in Ks:
        key, kw, kb = jax.random.split(key, 3)
        # nn.Conv1d(E, Nf, k): weight (Nf, E, k), bias (Nf,)
        w = jax.random.normal(kw, (Nf, E, k), jnp.float32) * 0.1
        b = jax.random.normal(kb, (Nf,), jnp.float32) * 0.1
        # kernel layout: (k*E, Nf), tap-major rows -> matches im2col lane ordering
        w_im2col = jnp.transpose(w, (2, 1, 0)).reshape(k * E, Nf)
        params["convs"].append((w_im2col, b.reshape(1, Nf)))
    key, kw, kb = jax.random.split(key, 3)
    # nn.Linear(3*Nf, C): weight (C, 3*Nf), bias (C,)
    w_fc = jax.random.normal(kw, (C, len(Ks) * Nf), jnp.float32) * 0.1
    b_fc = jax.random.normal(kb, (C,), jnp.float32) * 0.1
    params["fc"] = (jnp.transpose(w_fc, (1, 0)), b_fc.reshape(1, C))
    return params


@functools.partial(jax.jit, static_argnames=("Ks",))
def textcnn_forward(sents, params, Ks):
    """sents: (B, T, E) float32 — stands in for elmo_representations[-1]."""
    B, T, E = sents.shape
    Nf = params["convs"][0][0].shape[-1]
    C = params["fc"][0].shape[-1]

    call = _make_fused_textcnn_call(B, T, E, Nf, Ks, C)
    args = [sents]
    for w, b in params["convs"]:
        args.extend([w, b])
    args.extend(list(params["fc"]))
    return call(*args)                                   # (B, C)


if __name__ == "__main__":
    B, T, E = 2, 16, 32
    Nf, Ks, C = 8, (3, 4, 5), 4

    root = jax.random.PRNGKey(0)
    k_emb, k_par = jax.random.split(root)

    # Synthetic stand-in for the Elmo representation output (B, T, E).
    sents = jax.random.normal(k_emb, (B, T, E), jnp.float32)
    params = init_params(k_par, E, Nf, Ks, C)

    out = textcnn_forward(sents, params, Ks)
    jax.block_until_ready(out)
    assert out.shape == (B, C) and out.dtype == jnp.float32
    print("KERNEL_OK")
</pallas_src>

<mosaic_0001>
module attributes {stable_mosaic.version = 11 : i64} {
  func.func @kernel(%arg0: i32, %arg1: memref<2x16x32xf32, #tpu.memory_space<vmem>>, %arg2: memref<96x8xf32, #tpu.memory_space<vmem>>, %arg3: memref<1x8xf32, #tpu.memory_space<vmem>>, %arg4: memref<128x8xf32, #tpu.memory_space<vmem>>, %arg5: memref<1x8xf32, #tpu.memory_space<vmem>>, %arg6: memref<160x8xf32, #tpu.memory_space<vmem>>, %arg7: memref<1x8xf32, #tpu.memory_space<vmem>>, %arg8: memref<24x4xf32, #tpu.memory_space<vmem>>, %arg9: memref<1x4xf32, #tpu.memory_space<vmem>>, %arg10: memref<2x4xf32, #tpu.memory_space<vmem>>) attributes {dimension_semantics = [#tpu.dimension_semantics<arbitrary>], iteration_bounds = array<i64: 1>, scalar_prefetch = 0 : i64, scratch_operands = 0 : i64, tpu.core_type = #tpu.core_type<tc>, window_params = [{pipeline_mode = #tpu.pipeline_mode<synchronous>, transform_indices = @transform_0, window_bounds = array<i64: 2, 16, 32>}, {pipeline_mode = #tpu.pipeline_mode<synchronous>, transform_indices = @transform_1, window_bounds = array<i64: 96, 8>}, {pipeline_mode = #tpu.pipeline_mode<synchronous>, transform_indices = @transform_2, window_bounds = array<i64: 1, 8>}, {pipeline_mode = #tpu.pipeline_mode<synchronous>, transform_indices = @transform_3, window_bounds = array<i64: 128, 8>}, {pipeline_mode = #tpu.pipeline_mode<synchronous>, transform_indices = @transform_4, window_bounds = array<i64: 1, 8>}, {pipeline_mode = #tpu.pipeline_mode<synchronous>, transform_indices = @transform_5, window_bounds = array<i64: 160, 8>}, {pipeline_mode = #tpu.pipeline_mode<synchronous>, transform_indices = @transform_6, window_bounds = array<i64: 1, 8>}, {pipeline_mode = #tpu.pipeline_mode<synchronous>, transform_indices = @transform_7, window_bounds = array<i64: 24, 4>}, {pipeline_mode = #tpu.pipeline_mode<synchronous>, transform_indices = @transform_8, window_bounds = array<i64: 1, 4>}, {pipeline_mode = #tpu.pipeline_mode<synchronous>, transform_indices = @transform_9, window_bounds = array<i64: 2, 4>}]} {
    %c0 = arith.constant 0 : index
    %c0_0 = arith.constant 0 : index
    %c0_1 = arith.constant 0 : index
    %0 = vector.load %arg1[%c0, %c0_0, %c0_1] : memref<2x16x32xf32, #tpu.memory_space<vmem>>, vector<2x16x32xf32>
    %1 = vector.extract_strided_slice %0 {offsets = [0, 0, 0], sizes = [2, 14, 32], strides = [1, 1, 1]} : vector<2x16x32xf32> to vector<2x14x32xf32>
    %2 = vector.extract_strided_slice %0 {offsets = [0, 1, 0], sizes = [2, 14, 32], strides = [1, 1, 1]} : vector<2x16x32xf32> to vector<2x14x32xf32>
    %3 = vector.extract_strided_slice %0 {offsets = [0, 2, 0], sizes = [2, 14, 32], strides = [1, 1, 1]} : vector<2x16x32xf32> to vector<2x14x32xf32>
    %4 = tpu.concatenate %1, %2, %3 in 2 : vector<2x14x32xf32>, vector<2x14x32xf32>, vector<2x14x32xf32> -> vector<2x14x96xf32>
    %c0_2 = arith.constant 0 : index
    %c0_3 = arith.constant 0 : index
    %5 = vector.load %arg2[%c0_2, %c0_3] : memref<96x8xf32, #tpu.memory_space<vmem>>, vector<96x8xf32>
    %cst = arith.constant dense<0.000000e+00> : vector<2x14x8xf32>
    %6 = tpu.matmul %4, %5, %cst {dimension_numbers = #tpu.dot_dimension_numbers<[2], [0], [0, 1], [1], [0, 0, 0, 1, 1, 1], [], []>} : vector<2x14x96xf32>, vector<96x8xf32>, vector<2x14x8xf32> -> vector<2x14x8xf32>
    %cst_4 = arith.constant dense<0xFF800000> : vector<2x8xf32>
    %7 = vector.multi_reduction <maximumf>, %6, %cst_4 [1] : vector<2x14x8xf32> to vector<2x8xf32>
    %c0_5 = arith.constant 0 : index
    %c0_6 = arith.constant 0 : index
    %8 = vector.load %arg3[%c0_5, %c0_6] : memref<1x8xf32, #tpu.memory_space<vmem>>, vector<1x8xf32>
    %9 = vector.broadcast %8 : vector<1x8xf32> to vector<2x8xf32>
    %10 = arith.addf %7, %9 : vector<2x8xf32>
    %cst_7 = arith.constant 0.000000e+00 : f32
    %11 = vector.broadcast %cst_7 : f32 to vector<2x8xf32>
    %12 = arith.maximumf %10, %11 : vector<2x8xf32>
    %13 = vector.extract_strided_slice %0 {offsets = [0, 0, 0], sizes = [2, 13, 32], strides = [1, 1, 1]} : vector<2x16x32xf32> to vector<2x13x32xf32>
    %14 = vector.extract_strided_slice %0 {offsets = [0, 1, 0], sizes = [2, 13, 32], strides = [1, 1, 1]} : vector<2x16x32xf32> to vector<2x13x32xf32>
    %15 = vector.extract_strided_slice %0 {offsets = [0, 2, 0], sizes = [2, 13, 32], strides = [1, 1, 1]} : vector<2x16x32xf32> to vector<2x13x32xf32>
    %16 = vector.extract_strided_slice %0 {offsets = [0, 3, 0], sizes = [2, 13, 32], strides = [1, 1, 1]} : vector<2x16x32xf32> to vector<2x13x32xf32>
    %17 = tpu.concatenate %13, %14, %15, %16 in 2 : vector<2x13x32xf32>, vector<2x13x32xf32>, vector<2x13x32xf32>, vector<2x13x32xf32> -> vector<2x13x128xf32>
    %c0_8 = arith.constant 0 : index
    %c0_9 = arith.constant 0 : index
    %18 = vector.load %arg4[%c0_8, %c0_9] : memref<128x8xf32, #tpu.memory_space<vmem>>, vector<128x8xf32>
    %cst_10 = arith.constant dense<0.000000e+00> : vector<2x13x8xf32>
    %19 = tpu.matmul %17, %18, %cst_10 {dimension_numbers = #tpu.dot_dimension_numbers<[2], [0], [0, 1], [1], [0, 0, 0, 1, 1, 1], [], []>} : vector<2x13x128xf32>, vector<128x8xf32>, vector<2x13x8xf32> -> vector<2x13x8xf32>
    %cst_11 = arith.constant dense<0xFF800000> : vector<2x8xf32>
    %20 = vector.multi_reduction <maximumf>, %19, %cst_11 [1] : vector<2x13x8xf32> to vector<2x8xf32>
    %c0_12 = arith.constant 0 : index
    %c0_13 = arith.constant 0 : index
    %21 = vector.load %arg5[%c0_12, %c0_13] : memref<1x8xf32, #tpu.memory_space<vmem>>, vector<1x8xf32>
    %22 = vector.broadcast %21 : vector<1x8xf32> to vector<2x8xf32>
    %23 = arith.addf %20, %22 : vector<2x8xf32>
    %cst_14 = arith.constant 0.000000e+00 : f32
    %24 = vector.broadcast %cst_14 : f32 to vector<2x8xf32>
    %25 = arith.maximumf %23, %24 : vector<2x8xf32>
    %26 = vector.extract_strided_slice %0 {offsets = [0, 0, 0], sizes = [2, 12, 32], strides = [1, 1, 1]} : vector<2x16x32xf32> to vector<2x12x32xf32>
    %27 = vector.extract_strided_slice %0 {offsets = [0, 1, 0], sizes = [2, 12, 32], strides = [1, 1, 1]} : vector<2x16x32xf32> to vector<2x12x32xf32>
    %28 = vector.extract_strided_slice %0 {offsets = [0, 2, 0], sizes = [2, 12, 32], strides = [1, 1, 1]} : vector<2x16x32xf32> to vector<2x12x32xf32>
    %29 = vector.extract_strided_slice %0 {offsets = [0, 3, 0], sizes = [2, 12, 32], strides = [1, 1, 1]} : vector<2x16x32xf32> to vector<2x12x32xf32>
    %30 = vector.extract_strided_slice %0 {offsets = [0, 4, 0], sizes = [2, 12, 32], strides = [1, 1, 1]} : vector<2x16x32xf32> to vector<2x12x32xf32>
    %31 = tpu.concatenate %26, %27, %28, %29, %30 in 2 : vector<2x12x32xf32>, vector<2x12x32xf32>, vector<2x12x32xf32>, vector<2x12x32xf32>, vector<2x12x32xf32> -> vector<2x12x160xf32>
    %c0_15 = arith.constant 0 : index
    %c0_16 = arith.constant 0 : index
    %32 = vector.load %arg6[%c0_15, %c0_16] : memref<160x8xf32, #tpu.memory_space<vmem>>, vector<160x8xf32>
    %cst_17 = arith.constant dense<0.000000e+00> : vector<2x12x8xf32>
    %33 = tpu.matmul %31, %32, %cst_17 {dimension_numbers = #tpu.dot_dimension_numbers<[2], [0], [0, 1], [1], [0, 0, 0, 1, 1, 1], [], []>} : vector<2x12x160xf32>, vector<160x8xf32>, vector<2x12x8xf32> -> vector<2x12x8xf32>
    %cst_18 = arith.constant dense<0xFF800000> : vector<2x8xf32>
    %34 = vector.multi_reduction <maximumf>, %33, %cst_18 [1] : vector<2x12x8xf32> to vector<2x8xf32>
    %c0_19 = arith.constant 0 : index
    %c0_20 = arith.constant 0 : index
    %35 = vector.load %arg7[%c0_19, %c0_20] : memref<1x8xf32, #tpu.memory_space<vmem>>, vector<1x8xf32>
    %36 = vector.broadcast %35 : vector<1x8xf32> to vector<2x8xf32>
    %37 = arith.addf %34, %36 : vector<2x8xf32>
    %cst_21 = arith.constant 0.000000e+00 : f32
    %38 = vector.broadcast %cst_21 : f32 to vector<2x8xf32>
    %39 = arith.maximumf %37, %38 : vector<2x8xf32>
    %40 = tpu.concatenate %12, %25, %39 in 1 : vector<2x8xf32>, vector<2x8xf32>, vector<2x8xf32> -> vector<2x24xf32>
    %c0_22 = arith.constant 0 : index
    %c0_23 = arith.constant 0 : index
    %41 = vector.load %arg8[%c0_22, %c0_23] : memref<24x4xf32, #tpu.memory_space<vmem>>, vector<24x4xf32>
    %cst_24 = arith.constant dense<0.000000e+00> : vector<2x4xf32>
    %42 = tpu.matmul %40, %41, %cst_24 {dimension_numbers = #tpu.dot_dimension_numbers<[1], [0], [0], [1], [0, 0, 1, 1], [], []>} : vector<2x24xf32>, vector<24x4xf32>, vector<2x4xf32> -> vector<2x4xf32>
    %c0_25 = arith.constant 0 : index
    %c0_26 = arith.constant 0 : index
    %43 = vector.load %arg9[%c0_25, %c0_26] : memref<1x4xf32, #tpu.memory_space<vmem>>, vector<1x4xf32>
    %44 = vector.broadcast %43 : vector<1x4xf32> to vector<2x4xf32>
    %45 = arith.addf %42, %44 : vector<2x4xf32>
    %c0_27 = arith.constant 0 : index
    %c0_28 = arith.constant 0 : index
    %46 = vector.load %arg10[%c0_27, %c0_28] : memref<2x4xf32, #tpu.memory_space<vmem>>, vector<2x4xf32>
    tpu.vector_store %arg10[%c0_27, %c0_28], %45 {strides = array<i32>} : memref<2x4xf32, #tpu.memory_space<vmem>>, vector<2x4xf32>,
    return
  }
  func.func @transform_0(%arg0: i32) -> (i32, i32, i32) {
    %c0_i32 = arith.constant 0 : i32
    %c0_i32_0 = arith.constant 0 : i32
    %c0_i32_1 = arith.constant 0 : i32
    %c0_i32_2 = arith.constant 0 : i32
    return %c0_i32, %c0_i32_0, %c0_i32_1 : i32, i32, i32
  }
  func.func @transform_1(%arg0: i32) -> (i32, i32) {
    %c0_i32 = arith.constant 0 : i32
    %c0_i32_0 = arith.constant 0 : i32
    %c0_i32_1 = arith.constant 0 : i32
    return %c0_i32, %c0_i32_0 : i32, i32
  }
  func.func @transform_2(%arg0: i32) -> (i32, i32) {
    %c0_i32 = arith.constant 0 : i32
    %c0_i32_0 = arith.constant 0 : i32
    %c0_i32_1 = arith.constant 0 : i32
    return %c0_i32, %c0_i32_0 : i32, i32
  }
  func.func @transform_3(%arg0: i32) -> (i32, i32) {
    %c0_i32 = arith.constant 0 : i32
    %c0_i32_0 = arith.constant 0 : i32
    %c0_i32_1 = arith.constant 0 : i32
    return %c0_i32, %c0_i32_0 : i32, i32
  }
  func.func @transform_4(%arg0: i32) -> (i32, i32) {
    %c0_i32 = arith.constant 0 : i32
    %c0_i32_0 = arith.constant 0 : i32
    %c0_i32_1 = arith.constant 0 : i32
    return %c0_i32, %c0_i32_0 : i32, i32
  }
  func.func @transform_5(%arg0: i32) -> (i32, i32) {
    %c0_i32 = arith.constant 0 : i32
    %c0_i32_0 = arith.constant 0 : i32
    %c0_i32_1 = arith.constant 0 : i32
    return %c0_i32, %c0_i32_0 : i32, i32
  }
  func.func @transform_6(%arg0: i32) -> (i32, i32) {
    %c0_i32 = arith.constant 0 : i32
    %c0_i32_0 = arith.constant 0 : i32
    %c0_i32_1 = arith.constant 0 : i32
    return %c0_i32, %c0_i32_0 : i32, i32
  }
  func.func @transform_7(%arg0: i32) -> (i32, i32) {
    %c0_i32 = arith.constant 0 : i32
    %c0_i32_0 = arith.constant 0 : i32
    %c0_i32_1 = arith.constant 0 : i32
    return %c0_i32, %c0_i32_0 : i32, i32
  }
  func.func @transform_8(%arg0: i32) -> (i32, i32) {
    %c0_i32 = arith.constant 0 : i32
    %c0_i32_0 = arith.constant 0 : i32
    %c0_i32_1 = arith.constant 0 : i32
    return %c0_i32, %c0_i32_0 : i32, i32
  }
  func.func @transform_9(%arg0: i32) -> (i32, i32) {
    %c0_i32 = arith.constant 0 : i32
    %c0_i32_0 = arith.constant 0 : i32
    %c0_i32_1 = arith.constant 0 : i32
    return %c0_i32, %c0_i32_0 : i32, i32
  }
}

</mosaic_0001>

<bundles_post_ra>
// kernel: textcnn_forward.1
= control target key start
LH: loop header
LB: loop body
LE: loop exit
PB: predicated region body
PF: predicated region fallthrough
CT: control target
= control target key end

     0   :  { %vm41_vm0 = vcmask 1046528   ;;  %vm60_vm1 = vcmask 1045504   ;;  %s1896_s19 = smov 32   ;;  %v1897_v19 = vmov 0.0|0.0   ;;  %s1898_s29 = smov 64   ;;  %vm488_vm2 = vcmask 1044480   ;;  %s2397_s0 = inlined_call_operand.vmem [shape: f32[2,16,32], index: 0, kind: input, shape index: {}]   ;;  %s2398_s1 = inlined_call_operand.vmem [shape: f32[96,8], index: 1, kind: input, shape index: {}]   ;;  %s2399_s2 = inlined_call_operand.vmem [shape: f32[1,8], index: 2, kind: input, shape index: {}]   ;;  %s2400_s3 = inlined_call_operand.vmem [shape: f32[128,8], index: 3, kind: input, shape index: {}]   ;;  %s2401_s4 = inlined_call_operand.vmem [shape: f32[1,8], index: 4, kind: input, shape index: {}]   ;;  %s2402_s5 = inlined_call_operand.vmem [shape: f32[160,8], index: 5, kind: input, shape index: {}]   ;;  %s2403_s6 = inlined_call_operand.vmem [shape: f32[1,8], index: 6, kind: input, shape index: {}]   ;;  %s2404_s7 = inlined_call_operand.vmem [shape: f32[24,4], index: 7, kind: input, shape index: {}]   ;;  %s2405_s8 = inlined_call_operand.vmem [shape: f32[1,4], index: 8, kind: input, shape index: {}]   ;;  %s2406_s9 = inlined_call_operand.hbm [shape: f32[2,4], index: 9, kind: output, shape index: {}]  }
   0x1   :  { %v1960_v0 = vld [vmem:[%s2397_s0 + $0x8] sm:$0xff]  ;;  %v1965_v1 = vld [vmem:[%s2397_s0] sm:$0xff]  ;;  %v1974_v6 = vld [vmem:[%s2397_s0 + $0x10] sm:$0xff]  ;;  %1828 = vmatprep.subr.bf16.mxu0 %v1897_v19  ;;  %vm1341_vm3 = vcmask 1043456   ;;  %vm79_vm4 = vcmask 261120  }
   0x2   :  { %v43_v2 = vrot.slane %v1960_v0, 1  ;;  %v42_v3 = vrot.slane %v1965_v1, 1  ;;  %v62_v4 = vrot.slane %v1960_v0, 2  ;;  %v61_v5 = vrot.slane %v1965_v1, 2  ;;  %v1979_v7 = vld [vmem:[%s2397_s0 + $0x18] sm:$0xff]  ;;  %v1348_v8 = vld [vmem:[%s2402_s5] sm:$0xff] }
   0x3   :  { %v1349_v10 = vld [vmem:[%s2402_s5 + $0x8] sm:$0xff]  ;;  %v64_v11 = vrot.slane %v1974_v6, 2  ;;  %v65_v12 = vrot.slane %v1979_v7, 2  ;;  %v45_v13 = vrot.slane %v1974_v6, 1  ;;  %v1350_v14 = vld [vmem:[%s2402_s5 + $0x10] sm:$0xff]  ;;  %v1351_v15 = vld [vmem:[%s2402_s5 + $0x18] sm:$0xff] }
   0x4   :  { %50 = vrot.lane.b32.xlu1 %v43_v2, %s1896_s19  ;;  %v44_v9 = vsel %vm41_vm0, %v42_v3, %v43_v2  ;;  %v63_v16 = vsel %vm60_vm1, %v61_v5, %v62_v4  ;;  %v46_v17 = vrot.slane %v1979_v7, 1  ;;  %v1829_v18 = vpack.c.bf16 %v1349_v10, %v1348_v8  ;;  %v89_v20 = vld [vmem:[%s2398_s1] sm:$0xff]  ;;  %v90_v21 = vld [vmem:[%s2398_s1 + $0x8] sm:$0xff]  ;;  %v91_v25 = vld [vmem:[%s2398_s1 + $0x10] sm:$0xff] }
   0x5   :  { %48 = vrot.lane.b32.xlu0 %v44_v9, %s1896_s19  ;;  %v492_v22 = vrot.slane %v1974_v6, 3  ;;  %v1832_v23 = vpack.c.bf16 %v1351_v15, %v1350_v14  ;;  %v1772_v24 = vpack.c.bf16 %v90_v21, %v89_v20  ;;  %v92_v26 = vld [vmem:[%s2398_s1 + $0x18] sm:$0xff]  ;;  %v66_v27 = vsel %vm60_vm1, %v64_v11, %v65_v12  ;;  %v1352_v31 = vld [vmem:[%s2402_s5 + $0x20] sm:$0xff]  ;;  %v1353_v32 = vld [vmem:[%s2402_s5 + $0x28] sm:$0xff] }
   0x6   :  { %1830 = vmatpush1.bf16.msra.mxu0 %v1829_v18  ;;  %v493_v28 = vrot.slane %v1979_v7, 3  ;;  %v489_v29 = vrot.slane %v1965_v1, 3  ;;  %v490_v30 = vrot.slane %v1960_v0, 3  ;;  %v47_v33 = vsel %vm41_vm0, %v45_v13, %v46_v17  ;;  %v93_v35 = vld [vmem:[%s2398_s1 + $0x20] sm:$0xff]  ;;  %v94_v36 = vld [vmem:[%s2398_s1 + $0x28] sm:$0xff]  ;;  %v1354_v42 = vld [vmem:[%s2402_s5 + $0x30] sm:$0xff] }
   0x7   :  { %1831 = vmatprep.subr.bf16.mxu0 %v1897_v19  ;;  %1773 = vmatprep.subr.bf16.mxu1 %v1772_v24  ;;  %v1776_v34 = vpack.c.bf16 %v92_v26, %v91_v25  ;;  %v1835_v37 = vpack.c.bf16 %v1353_v32, %v1352_v31  ;;  %v1342_v38 = vrot.slane %v1965_v1, 4  ;;  %v1343_v39 = vrot.slane %v1960_v0, 4  ;;  %v1355_v43 = vld [vmem:[%s2402_s5 + $0x38] sm:$0xff]  ;;  %v95_v48 = vld [vmem:[%s2398_s1 + $0x30] sm:$0xff] }
   0x8   :  { %69 = vrot.lane.b32.xlu1 %v62_v4, %s1898_s29  ;;  %1775 = vmatpush3.bf16.msra.mxu1 %v1772_v24  ;;  %v494_v40 = vsel %vm488_vm2, %v492_v22, %v493_v28  ;;  %v491_v41 = vsel %vm488_vm2, %v489_v29, %v490_v30  ;;  %v1345_v44 = vrot.slane %v1974_v6, 4  ;;  %v1780_v45 = vpack.c.bf16 %v94_v36, %v93_v35  ;;  %v96_v49 = vld [vmem:[%s2398_s1 + $0x38] sm:$0xff] }
   0x9   :  { %67 = vrot.lane.b32.xlu0 %v63_v16, %s1898_s29  ;;  %1777 = vmatprep.subr.bf16.mxu1 %v1776_v34  ;;  %v1344_v46 = vsel %vm1341_vm3, %v1342_v38, %v1343_v39  ;;  %v1346_v47 = vrot.slane %v1979_v7, 4 }
   0xa   :  { %1833 = vmatpush1.bf16.msra.mxu0 %v1832_v23  ;;  %1649 = vmatprep.mubr.msk.f32.mxu0 %vm79_vm4, %v1344_v46 }
   0xb   :  { %1834 = vmatprep.subr.bf16.mxu0 %v1897_v19 }
   0xc   :  { %71 = vrot.lane.b32.xlu1 %v66_v27, %s1898_s29  ;;  %1779 = vmatpush3.bf16.msra.mxu1 %v1776_v34 }
   0xd   :  { %52 = vrot.lane.b32.xlu0 %v47_v33, %s1896_s19 }
   0xe   :  { %14 = vsyncpa [#allocation3], 0  ;;  %s1899_s30 = smov 96   ;;  %1836 = vmatpush1.bf16.msra.mxu0 %v1835_v37  ;;  %v1838_v50 = vpack.c.bf16 %v1355_v43, %v1354_v42  ;;  %v2063_v51 = vsel %vm1341_vm3, %v1345_v44, %v1346_v47  ;;  %v1356_v52 = vld [vmem:[%s2402_s5 + $0x40] sm:$0xff]  ;;  %v1357_v53 = vld [vmem:[%s2402_s5 + $0x48] sm:$0xff]  ;;  %1781 = vmatprep.subr.bf16.mxu1 %v1780_v45  ;;  %v1784_v55 = vpack.c.bf16 %v96_v49, %v95_v48  ;;  %v109_v24 = vlaneseq  ;;  %s1905_s12 = smov 8  }
   0xf   :  { %1837 = vmatprep.subr.bf16.mxu0 %v1897_v19  ;;  %v2073_v54 = vcombine.low %v1343_v39, %v2063_v51  ;;  %v97_v56 = vld [vmem:[%s2398_s1 + $0x40] sm:$0xff]  ;;  %v98_v57 = vld [vmem:[%s2398_s1 + $0x48] sm:$0xff]  ;;  %v1841_v58 = vpack.c.bf16 %v1357_v53, %v1356_v52  ;;  %v1358_v59 = vld [vmem:[%s2402_s5 + $0x50] sm:$0xff]  ;;  %v1900_v22 = vmov 1983009808   ;;  %vm84_vm5 = vcmask 523264  }
  0x10   :  { %499 = vrot.lane.b32.xlu1 %v494_v40, %s1899_s30  ;;  %1783 = vmatpush3.bf16.msra.mxu1 %v1780_v45  ;;  %v1359_v60 = vld [vmem:[%s2402_s5 + $0x58] sm:$0xff]  ;;  %v99_v61 = vld [vmem:[%s2398_s1 + $0x50] sm:$0xff]  ;;  %v1788_v63 = vpack.c.bf16 %v98_v57, %v97_v56  ;;  %v1360_v3 = vld [vmem:[%s2402_s5 + $0x60] sm:$0xff]  ;;  %v107_v23 = vunpack.c.l.s4 %v1900_v22  ;;  %v110_v26 = vshrl.u32 %v109_v24, 7  ;;  %v1901_v31 = vmov 1966171168  }
  0x11   :  { %495 = vrot.lane.b32.xlu0 %v491_v41, %s1899_s30  ;;  %v100_v62 = vld [vmem:[%s2398_s1 + $0x58] sm:$0xff]  ;;  %1785 = vmatprep.subr.bf16.mxu1 %v1784_v55  ;;  %v1844_v2 = vpack.c.bf16 %v1359_v60, %v1358_v59  ;;  %v1361_v5 = vld [vmem:[%s2402_s5 + $0x68] sm:$0xff]  ;;  %v511_v8 = vld [vmem:[%s2400_s3] sm:$0xff]  ;;  %v533_v32 = vunpack.c.l.s4 %v1901_v31  ;;  %vm230_vm6 = vcmask 785408   ;;  %vm457_vm7 = vcmask 64512   ;;  %s1906_s14 = smov [#allocation2]  }
  0x12   :  { %1839 = vmatpush1.bf16.msra.mxu0 %v1838_v50  ;;  %v1792_v4 = vpack.c.bf16 %v100_v62, %v99_v61  ;;  %v512_v9 = vld [vmem:[%s2400_s3 + $0x8] sm:$0xff]  ;;  %v1847_v10 = vpack.c.bf16 %v1361_v5, %v1360_v3  ;;  %v1363_v13 = vld [vmem:[%s2402_s5 + $0x78] sm:$0xff]  ;;  %v1364_v15 = vld [vmem:[%s2402_s5 + $0x80] sm:$0xff]  ;;  %v108_v25 = vunpack.c.0.s8 %v107_v23  ;;  %vm1481_vm8 = vcmask 60416   ;;  %s1625_s15 = sshll.u32 %s1906_s14, 4  ;;  %s1626_s15 = int_to_ptr.vmem [resolvable:$true] %s1625_s15 }
  0x13   :  { %1840 = vmatprep.subr.bf16.mxu0 %v1897_v19  ;;  %v2113_v11 = vpack.c.bf16 %v512_v9, %v511_v8  ;;  %v1365_v16 = vld [vmem:[%s2402_s5 + $0x88] sm:$0xff]  ;;  %v1366_v18 = vld [vmem:[%s2402_s5 + $0x90] sm:$0xff]  ;;  %v1367_v20 = vld [vmem:[%s2402_s5 + $0x98] sm:$0xff]  ;;  %v534_v40 = vunpack.c.0.s8 %v533_v32  ;;  %vm459_vm9 = vcmask 62464   ;;  %vm1513_vm10 = vcmask 1041409   ;;  %s1872_s16 = scalar_lea.vmem %s1626_s15, 32  ;;  %p1877_p1 = scmp.lt.s32.totalorder %s1626_s15, %s1626_s15 }
  0x14   :  { %54 = vrot.lane.b32.xlu1 %v46_v17, %s1896_s19  ;;  %1787 = vmatpush3.bf16.msra.mxu1 %v1784_v55  ;;  %v1853_v17 = vpack.c.bf16 %v1365_v16, %v1364_v15  ;;  %v1856_v21 = vpack.c.bf16 %v1367_v20, %v1366_v18  ;;  %v2139_v29 = vsub.s32 %v108_v25, %v110_v26  ;;  %v516_v15 = vld [vmem:[%s2400_s3 + $0x28] sm:$0xff]  ;;  %v517_v16 = vld [vmem:[%s2400_s3 + $0x30] sm:$0xff]  ;;  %vm1312_vm11 = vcmask 61440   ;;  %p1873_p0 = scmp.ne.s32.totalorder %s1626_s15, %s1872_s16  ;;  %p1878_p2 = scmp.lt.s32.totalorder %s1872_s16, %s1872_s16 }
  0x15   :  { %497 = vrot.lane.b32.xlu0 %v490_v30, %s1899_s30  ;;  %1789 = vmatprep.subr.bf16.mxu1 %v1788_v63  ;;  %v2153_v49 = vsub.s32 %v534_v40, %v110_v26  ;;  %vm1904_vm12 = vmmov 0   ;;  %vm1531_vm13 = vcmask 130048   ;;  %vm1543_vm14 = vcmask 195584  }
  0x16   :  { %1842 = vmatpush1.bf16.msra.mxu0 %v1841_v58  ;;  %vm1617_vm15 = vcmask 25600   ;;  %p1879_p3 = por %p1878_p2, %p1877_p1 }
  0x17   :  { %1843 = vmatprep.subr.bf16.mxu0 %v1897_v19 }
  0x18   :  { %501 = vrot.lane.b32.xlu1 %v493_v28, %s1899_s30  ;;  %1791 = vmatpush3.bf16.msra.mxu1 %v1788_v63  ;;  %p1880_p4 = pnand %p1879_p3, %p1873_p0 }
  0x19   :  { %73 = vrot.lane.b32.xlu0 %v65_v12, %s1898_s29  ;;  %1793 = vmatprep.subr.bf16.mxu1 %v1792_v4  ;;  %v1362_v12 = vld [vmem:[%s2402_s5 + $0x70] sm:$0xff] }
  0x1a   :  { %1845 = vmatpush1.bf16.msra.mxu0 %v1844_v2  ;;  %v1850_v14 = vpack.c.bf16 %v1363_v13, %v1362_v12  ;;  %v513_v12 = vld [vmem:[%s2400_s3 + $0x10] sm:$0xff]  ;;  %v514_v13 = vld [vmem:[%s2400_s3 + $0x18] sm:$0xff] }
  0x1b   :  { %1846 = vmatprep.subr.bf16.mxu0 %v1897_v19 }
  0x1c   :  { %1795 = vmatpush3.bf16.msra.mxu1 %v1792_v4 }
  0x1d   :  { %1797 = vmatprep.subr.bf16.mxu1 %v2113_v11 }
  0x1e   :  { %1848 = vmatpush1.bf16.msra.mxu0 %v1847_v10 }
  0x1f   :  { %1849 = vmatprep.subr.bf16.mxu0 %v1897_v19 }
  0x22   :  { %1851 = vmatpush1.bf16.msra.mxu0 %v1850_v14 }
  0x23   :  { %1852 = vmatprep.subr.bf16.mxu0 %v1897_v19 }
  0x26   :  { %1854 = vmatpush1.bf16.msra.mxu0 %v1853_v17  ;;  %v518_v17 = vld [vmem:[%s2400_s3 + $0x38] sm:$0xff] }
  0x27   :  { %1855 = vmatprep.subr.bf16.mxu0 %v1897_v19  ;;  %v2191_v32 = vpack.c.bf16 %v518_v17, %v517_v16 }
  0x2a   :  { %1857 = vmatpush1.bf16.msra.mxu0 %v1856_v21 }
  0x2b   :  { %1858 = vmatprep.subr.bf16.mxu0 %v1897_v19 }
  0x76   :  { %v51_v27 = vpop.permute.xlu1 %50 }
  0x77   :  { %v49_v28 = vpop.permute.xlu0 %48  ;;  %v81_v33 = vsel %vm79_vm4, %v1960_v0, %v51_v27 }
  0x78   :  { %v80_v34 = vsel %vm79_vm4, %v1965_v1, %v49_v28 }
  0x7a   :  { %v70_v30 = vpop.permute.xlu1 %69 }
  0x7b   :  { %v68_v19 = vpop.permute.xlu0 %67  ;;  %v86_v38 = vsel %vm84_vm5, %v81_v33, %v70_v30  ;;  %v1800_v30 = vpack.c.bf16 %v514_v13, %v513_v12 }
  0x7c   :  { %v85_v35 = vsel %vm84_vm5, %v80_v34, %v68_v19  ;;  %v129_v44 = vrot.slane %v86_v38, %v2139_v29  ;;  %v122_v48 = vcombine.high %v86_v38, %v86_v38 }
  0x7d   :  { %v105_v36 = vcombine.high %v85_v35, %v85_v35  ;;  %v112_v37 = vrot.slane %v85_v35, %v2139_v29 }
  0x7e   :  { %v72_v39 = vpop.permute.xlu1 %71  ;;  %v137_v56 = vcombine.high %v129_v44, %v129_v44  ;;  %v136_v59 = vrot.slane %v122_v48, %v2139_v29 }
  0x7f   :  { %v119_v41 = vrot.slane %v105_v36, %v2139_v29  ;;  %v120_v42 = vcombine.high %v112_v37, %v112_v37  ;;  %v53_v43 = vpop.permute.xlu0 %52 }
  0x80   :  { %v82_v0 = vsel %vm79_vm4, %v1974_v6, %v53_v43  ;;  %v188_v5 = vcombine.low %v129_v44, %v137_v56 }
  0x81   :  { %v87_v1 = vsel %vm84_vm5, %v82_v0, %v72_v39  ;;  %v121_v45 = vcombine.high %v119_v41, %v119_v41  ;;  %v171_v46 = vcombine.low %v112_v37, %v120_v42 }
  0x82   :  { %v500_v53 = vpop.permute.xlu1 %499  ;;  %v145_v55 = vrot.slane %v87_v1, %v2139_v29  ;;  %v138_v8 = vcombine.high %v87_v1, %v87_v1  ;;  %v196_v24 = vrot.slane %v188_v5, %v2139_v29 }
  0x83   :  { %v496_v50 = vpop.permute.xlu0 %495  ;;  %v172_v52 = vcombine.low %v119_v41, %v121_v45  ;;  %v179_v6 = vrot.slane %v171_v46, %v2139_v29  ;;  %v509_v14 = vsel %vm230_vm6, %v87_v1, %v500_v53 }
  0x84   :  { %v507_v57 = vsel %vm230_vm6, %v85_v35, %v496_v50  ;;  %v189_v2 = vcombine.low %v136_v59, %v145_v55  ;;  %v152_v25 = vrot.slane %v138_v8, %v2139_v29  ;;  %v153_v26 = vcombine.high %v145_v55, %v145_v55 }
  0x85   :  { %v186_v58 = vrot.slane %v172_v52, %v2139_v29  ;;  %v531_v60 = vcombine.high %v507_v57, %v507_v57  ;;  %v538_v61 = vrot.slane %v507_v57, %v2153_v49  ;;  %1454 = vmatmul.mubr.f32.vlgmr.msra.gmra.mrb[0].mxu0 %v507_v57  ;;  %v619_v33 = vcombine.high %v509_v14, %v509_v14 }
  0x86   :  { %1650 = vmatprep.mubr.msk.f32.mxu0 %vm79_vm4, %v2073_v54  ;;  %v55_v4 = vpop.permute.xlu1 %54  ;;  %v515_v54 = vld [vmem:[%s2400_s3 + $0x20] sm:$0xff]  ;;  %v203_v21 = vrot.slane %v189_v2, %v2139_v29  ;;  %v626_v34 = vrot.slane %v509_v14, %v2153_v49  ;;  %v205_v40 = vcombine.low %v153_v26, %v152_v25  ;;  %v154_v41 = vcombine.high %v152_v25, %v152_v25 }
  0x87   :  { %v498_v62 = vpop.permute.xlu0 %497  ;;  %v187_v63 = vcombine.low %v179_v6, %v186_v58  ;;  %v545_v3 = vrot.slane %v531_v60, %v2153_v49  ;;  %v546_v10 = vcombine.high %v538_v61, %v538_v61  ;;  %v83_v20 = vsel %vm79_vm4, %v1979_v7, %v55_v4 }
  0x88   :  { %v508_v9 = vsel %vm230_vm6, %v86_v38, %v498_v62  ;;  %v1804_v31 = vpack.c.bf16 %v516_v15, %v515_v54  ;;  %v204_v19 = vcombine.low %v196_v24, %v203_v21  ;;  %v554_v36 = vrot.slane %v538_v61, %v2153_v49 }
  0x89   :  { %1719 = vmatprep.mubr.msk.f32.mxu1 %vm230_vm6, %v187_v63  ;;  %v547_v18 = vcombine.high %v545_v3, %v545_v3  ;;  %v1645_v22 = vcombine.low %v508_v9, %v509_v14  ;;  %v568_v27 = vrot.slane %v546_v10, %v2153_v49  ;;  %v1372_v43 = vcombine.high %v509_v14, %v2063_v51  ;;  %v520_v10 = vld [vmem:[%s2400_s3 + $0x48] sm:$0xff] }
  0x8a   :  { %v502_v28 = vpop.permute.xlu1 %501  ;;  %1720 = vmatmul.mubr.msk.f32.vlgmr.msra.gmra.mrb[0].mxu1 %vm230_vm6, %v204_v19  ;;  %v561_v0 = vrot.slane %v545_v3, %v2153_v49  ;;  %v587_v1 = vrot.slane %v508_v9, %v2153_v49  ;;  %v633_v46 = vrot.slane %v619_v33, %v2153_v49  ;;  %v580_v48 = vcombine.high %v508_v9, %v508_v9 }
  0x8b   :  { %v74_v23 = vpop.permute.xlu0 %73  ;;  %1459 = vmatmul.mubr.f32.gmra.mrb[2].mxu0 %v1645_v22  ;;  %v575_v37 = vrot.slane %v547_v18, %v2153_v49  ;;  %v707_v44 = vcombine.low %v554_v36, %v568_v27  ;;  %1799 = vmatpush3.bf16.msra.mxu1 %v2113_v11  ;;  %v1638_v53 = vcombine.high %v554_v36, %v568_v27  ;;  %v521_v22 = vld [vmem:[%s2400_s3 + $0x50] sm:$0xff] }
  0x8c   :  { %v88_v35 = vsel %vm84_vm5, %v83_v20, %v74_v23  ;;  %1801 = vmatprep.subr.bf16.mxu1 %v1800_v30  ;;  %v213_v59 = vrot.slane %v205_v40, %v2139_v29  ;;  %v634_v60 = vcombine.high %v626_v34, %v626_v34  ;;  %v595_v61 = vcombine.high %v587_v1, %v587_v1  ;;  %v522_v23 = vld [vmem:[%s2400_s3 + $0x58] sm:$0xff]  ;;  %v523_v40 = vld [vmem:[%s2400_s3 + $0x60] sm:$0xff] }
  0x8d   :  { %v155_v38 = vcombine.high %v88_v35, %v88_v35  ;;  %v162_v39 = vrot.slane %v88_v35, %v2139_v29  ;;  %v2200_v42 = vsel %vm230_vm6, %v88_v35, %v502_v28  ;;  %v709_v55 = vcombine.low %v561_v0, %v575_v37 }
  0x8e   :  { %v675_v56 = vrot.slane %v2200_v42, %v2153_v49  ;;  %v1373_v57 = vcombine.low %v2200_v42, %v1346_v47  ;;  %v1639_v6 = vcombine.high %v561_v0, %v575_v37  ;;  %v717_v63 = vrot.slane %v707_v44, %v2153_v49 }
  0x8f   :  { %v169_v45 = vrot.slane %v155_v38, %v2139_v29  ;;  %v170_v50 = vcombine.high %v162_v39, %v162_v39  ;;  %v206_v52 = vcombine.low %v154_v41, %v162_v39  ;;  %1803 = vmatpush3.bf16.msra.mxu1 %v1800_v30  ;;  %v635_v2 = vcombine.high %v633_v46, %v633_v46  ;;  %v524_v41 = vld [vmem:[%s2400_s3 + $0x68] sm:$0xff] }
  0x90   :  { %v1648_v62 = vcombine.high %v2063_v51, %v1373_v57  ;;  %v594_v3 = vrot.slane %v580_v48, %v2153_v49  ;;  %1805 = vmatprep.subr.bf16.mxu1 %v1804_v31  ;;  %v1647_v7 = vcombine.low %v1372_v43, %v2200_v42  ;;  %v683_v4 = vcombine.high %v675_v56, %v675_v56  ;;  %v519_v51 = vld [vmem:[%s2400_s3 + $0x40] sm:$0xff] }
  0x91   :  { %v220_v11 = vrot.slane %v206_v52, %v2139_v29  ;;  %v222_v58 = vcombine.low %v170_v50, %v169_v45  ;;  %v690_v5 = vrot.slane %v675_v56, %v2153_v49  ;;  %v724_v9 = vrot.slane %v1638_v53, %v2153_v49  ;;  %v525_v53 = vld [vmem:[%s2400_s3 + $0x70] sm:$0xff] }
  0x92   :  { %1651 = vmatprep.mubr.msk.f32.mxu0 %vm79_vm4, %v1648_v62  ;;  %v642_v12 = vrot.slane %v626_v34, %v2153_v49  ;;  %v731_v13 = vrot.slane %v709_v55, %v2153_v49  ;;  %v738_v54 = vrot.slane %v1639_v6, %v2153_v49  ;;  %v649_v14 = vrot.slane %v633_v46, %v2153_v49  ;;  %v526_v55 = vld [vmem:[%s2400_s3 + $0x78] sm:$0xff] }
  0x93   :  { %v221_v47 = vcombine.low %v213_v59, %v220_v11  ;;  %v229_v8 = vrot.slane %v222_v58, %v2139_v29  ;;  %1464 = vmatmul.mubr.f32.gmra.mrb[4].mxu0 %v1647_v7  ;;  %v656_v15 = vrot.slane %v634_v60, %v2153_v49  ;;  %v616_v16 = vrot.slane %v595_v61, %v2153_v49 }
  0x94   :  { %1807 = vmatpush3.bf16.msra.mxu1 %v1804_v31  ;;  %v739_v17 = vcombine.low %v717_v63, %v724_v9  ;;  %v609_v18 = vrot.slane %v594_v3, %v2153_v49  ;;  %v740_v20 = vcombine.low %v731_v13, %v738_v54  ;;  %v1812_v21 = vpack.c.bf16 %v520_v10, %v519_v51 }
  0x95   :  { %1722 = vmatprep.mubr.msk.f32.mxu1 %vm230_vm6, %v221_v47  ;;  %1809 = vmatprep.subr.bf16.mxu1 %v2191_v32  ;;  %v663_v24 = vrot.slane %v635_v2, %v2153_v49  ;;  %v602_v25 = vrot.slane %v587_v1, %v2153_v49  ;;  %v704_v26 = vrot.slane %v683_v4, %v2153_v49 }
  0x96   :  { %1723 = vmatmul.mubr.msk.f32.gmra.mrb[2].mxu1 %vm230_vm6, %v229_v8  ;;  %v705_v27 = vcombine.high %v690_v5, %v690_v5  ;;  %v664_v28 = vcombine.high %v642_v12, %v642_v12  ;;  %v747_v30 = vrot.slane %v739_v17, %v2153_v49  ;;  %v754_v31 = vrot.slane %v740_v20, %v2153_v49 }
  0x97   :  { %v665_v33 = vcombine.high %v649_v14, %v649_v14  ;;  %v666_v34 = vcombine.high %v656_v15, %v656_v15  ;;  %v756_v19 = vcombine.low %v602_v25, %v616_v16  ;;  %v1816_v35 = vpack.c.bf16 %v522_v23, %v521_v22 }
  0x98   :  { %1811 = vmatpush3.bf16.msra.mxu1 %v2191_v32  ;;  %v1640_v36 = vcombine.high %v602_v25, %v616_v16  ;;  %v758_v37 = vcombine.low %v609_v18, %v642_v12  ;;  %v668_v38 = vcombine.high %v2200_v42, %v2200_v42  ;;  %v755_v39 = vcombine.low %v747_v30, %v754_v31 }
  0x99   :  { %1813 = vmatprep.subr.bf16.mxu1 %v1812_v21  ;;  %v667_v43 = vcombine.high %v663_v24, %v663_v24  ;;  %v808_v0 = vcombine.low %v704_v26, %v705_v27  ;;  %v759_v44 = vcombine.low %v656_v15, %v664_v28  ;;  %v805_v32 = vcombine.low %v666_v34, %v649_v14 }
  0x9a   :  { %1757 = vmatprep.mubr.f32.mxu1 %v755_v39  ;;  %v1820_v45 = vpack.c.bf16 %v524_v41, %v523_v40  ;;  %v806_v46 = vcombine.low %v663_v24, %v665_v33  ;;  %v766_v42 = vrot.slane %v756_v19, %v2153_v49  ;;  %v773_v48 = vrot.slane %v1640_v36, %v2153_v49 }
  0x9b   :  { %v807_v1 = vcombine.low %v667_v43, %v690_v5  ;;  %v780_v50 = vrot.slane %v758_v37, %v2153_v49  ;;  %v682_v52 = vrot.slane %v668_v38, %v2153_v49  ;;  %v836_v56 = vrot.slane %v808_v0, %v2153_v49 }
  0x9c   :  { %1815 = vmatpush3.bf16.msra.mxu1 %v1812_v21  ;;  %v787_v57 = vrot.slane %v759_v44, %v2153_v49  ;;  %v1824_v6 = vpack.c.bf16 %v526_v55, %v525_v53  ;;  %v815_v11 = vrot.slane %v805_v32, %v2153_v49  ;;  %v822_v58 = vrot.slane %v806_v46, %v2153_v49 }
  0x9d   :  { %1817 = vmatprep.subr.bf16.mxu1 %v1816_v35  ;;  %v829_v59 = vrot.slane %v807_v1, %v2153_v49  ;;  %v788_v60 = vcombine.low %v766_v42, %v773_v48  ;;  %v697_v62 = vrot.slane %v682_v52, %v2153_v49  ;;  %v706_v63 = vcombine.high %v704_v26, %v704_v26 }
  0x9e   :  { %v789_v61 = vcombine.low %v780_v50, %v787_v57  ;;  %v837_v3 = vcombine.low %v815_v11, %v822_v58 }
  0x9f   :  { %v838_v2 = vcombine.low %v829_v59, %v836_v56  ;;  %v796_v7 = vrot.slane %v788_v60, %v2153_v49  ;;  %v854_v4 = vcombine.low %v706_v63, %v697_v62 }
  0xa0   :  { %1819 = vmatpush3.bf16.msra.mxu1 %v1816_v35  ;;  %v803_v47 = vrot.slane %v789_v61, %v2153_v49  ;;  %v845_v8 = vrot.slane %v837_v3, %v2153_v49 }
  0xa1   :  { %1821 = vmatprep.subr.bf16.mxu1 %v1820_v45  ;;  %v852_v5 = vrot.slane %v838_v2, %v2153_v49  ;;  %v861_v51 = vrot.slane %v854_v4, %v2153_v49 }
  0xa2   :  { %v804_v9 = vcombine.low %v796_v7, %v803_v47 }
  0xa3   :  { %v853_v10 = vcombine.low %v845_v8, %v852_v5  ;;  %v868_v12 = vrot.slane %v861_v51, %v2153_v49 }
  0xa4   :  { %1823 = vmatpush3.bf16.msra.mxu1 %v1820_v45 }
  0xa5   :  { %1825 = vmatprep.subr.bf16.mxu1 %v1824_v6 }
  0xa8   :  { %1827 = vmatpush3.bf16.msra.mxu1 %v1824_v6 }
  0xab   :  { %1758 = vmatmul.mubr.f32.vlgmr.msra.gmra.mrb[4].mxu1 %v804_v9 }
  0xac   :  { %1760 = vmatprep.mubr.f32.mxu1 %v853_v10 }
  0xaf   :  { %1761 = vmatmul.mubr.f32.gmra.mrb[6].mxu1 %v868_v12 }
 0x158   :  { %v1455_v13 = vpop.f32.mrb[0].mxu0 }
 0x159   :  { %v1472_v54 = vcombine.high %v1455_v13, %v1455_v13  ;;  %v1457_v14 = vpop.f32.mrb[1].mxu0 }
 0x15b   :  { %v1476_v15 = vcombine.low %v1455_v13, %v1472_v54 }
 0x15d   :  { %v1480_v17 = vsel %vm457_vm7, %v1476_v15, -inf  ;;  %v1721_v22 = vpop.f32.mrb[0].mxu1 }
 0x15e   :  { %v1460_v16 = vpop.f32.mrb[2].mxu0  ;;  %v345_v23 = vcombine.high %v1721_v22, %v1721_v22  ;;  %v352_v24 = vrot.slane %v1721_v22, %v2139_v29  ;;  %v305_v25 = vpop.f32.mrb[1].mxu1 }
 0x15f   :  { %v1482_v18 = vsel %vm1481_vm8, %v1460_v16, -inf  ;;  %v1462_v20 = vpop.f32.mrb[3].mxu0  ;;  %v328_v27 = vcombine.high %v305_v25, %v305_v25  ;;  %v335_v28 = vrot.slane %v305_v25, %v2139_v29  ;;  %v1473_v40 = vcombine.high %v1460_v16, %v1460_v16  ;;  %v1533_v16 = vld [vmem:[%s2404_s7] sm:$0xff] }
 0x160   :  { %v1483_v21 = vmax.f32 %v1480_v17, %v1482_v18  ;;  %v359_v30 = vrot.slane %v345_v23, %v2139_v29  ;;  %v360_v31 = vcombine.high %v352_v24, %v352_v24  ;;  %v1534_v17 = vld [vmem:[%s2404_s7 + $0x8] sm:$0xff] }
 0x161   :  { %v342_v33 = vrot.slane %v328_v27, %v2139_v29  ;;  %v343_v34 = vcombine.high %v335_v28, %v335_v28  ;;  %v1859_v22 = vpack.c.bf16 %v1534_v17, %v1533_v16  ;;  %v1652_v27 = vld [vmem:[%s2403_s6] ss:$0 sm:$0xff]  ;;  %s1903_s6 = smov 16  }
 0x162   :  { %v1484_v26 = vrot.slane %v1483_v21, 4  ;;  %v404_v19 = vcombine.low %v352_v24, %v360_v31  ;;  %v418_v39 = vrot.slane %v359_v30, %v2139_v29  ;;  %v361_v61 = vcombine.high %v359_v30, %v359_v30  ;;  %v1535_v30 = vld [vmem:[%s2404_s7 + $0x10] sm:$0xff] }
 0x163   :  { %v344_v36 = vcombine.high %v342_v33, %v342_v33  ;;  %v387_v37 = vcombine.low %v335_v28, %v343_v34  ;;  %1860 = vmatpush3.bf16.msra.mxu0 %v1859_v22  ;;  %v1902_v28 = vmov 0.0  }
 0x164   :  { %v1485_v35 = vmax.f32 %v1483_v21, %v1484_v26  ;;  %v411_v38 = vrot.slane %v404_v19, %v2139_v29  ;;  %1767 = vmatprep.subr.mxu0 %v1902_v28  ;;  %1769 = vmatprep.mubr.msk.f32.mxu0 %vm1904_vm12, %v1902_v28 }
 0x165   :  { %v388_v41 = vcombine.low %v342_v33, %v344_v36  ;;  %v395_v46 = vrot.slane %v387_v37, %v2139_v29 }
 0x166   :  { %v1465_v43 = vpop.f32.mrb[4].mxu0  ;;  %v419_v0 = vcombine.low %v411_v38, %v418_v39  ;;  %v1486_v44 = vrot.slane %v1485_v35, 2 }
 0x167   :  { %v1474_v32 = vcombine.high %v1465_v43, %v1465_v43  ;;  %v1477_v1 = vcombine.low %v1473_v40, %v1465_v43  ;;  %v1467_v45 = vpop.f32.mrb[5].mxu0  ;;  %v402_v42 = vrot.slane %v388_v41, %v2139_v29  ;;  %1768 = vmatpush3.msra.mxu0 %v1535_v30 }
 0x168   :  { %v460_v58 = vsel %vm459_vm9, %v419_v0, -inf  ;;  %v1487_v59 = vmax.f32 %v1485_v35, %v1486_v44 }
 0x169   :  { %v1724_v48 = vpop.f32.mrb[2].mxu1  ;;  %v1490_v50 = vsel %vm457_vm7, %v1477_v1, -inf  ;;  %v1491_v52 = vsel %vm1481_vm8, %v1474_v32, -inf  ;;  %v403_v56 = vcombine.low %v395_v46, %v402_v42  ;;  %v2322_v42 = vld [vmem:[%s2399_s2] ss:$0 sm:$0xff] }
 0x16a   :  { %v385_v53 = vrot.slane %v1724_v48, %v2139_v29  ;;  %v315_v55 = vpop.f32.mrb[3].mxu1  ;;  %v1492_v57 = vmax.f32 %v1490_v50, %v1491_v52  ;;  %v1488_v51 = vrot.slane %v1487_v59, 1 }
 0x16b   :  { %v362_v6 = vcombine.high %v315_v55, %v315_v55  ;;  %v369_v11 = vrot.slane %v315_v55, %v2139_v29  ;;  %v458_v62 = vsel %vm457_vm7, %v403_v56, -inf }
 0x16c   :  { %v386_v60 = vcombine.high %v385_v53, %v385_v53  ;;  %v1493_v63 = vrot.slane %v1492_v57, 4  ;;  %v461_v7 = vmax.f32 %v458_v62, %v460_v58  ;;  %v1489_v26 = vmax.f32 %v1487_v59, %v1488_v51 }
 0x16d   :  { %v376_v2 = vrot.slane %v362_v6, %v2139_v29  ;;  %v377_v3 = vcombine.high %v369_v11, %v369_v11  ;;  %v420_v47 = vcombine.low %v361_v61, %v369_v11 }
 0x16e   :  { %v1494_v4 = vmax.f32 %v1492_v57, %v1493_v63  ;;  %v462_v9 = vrot.slane %v461_v7, 4  ;;  %v451_v10 = vrot.slane %v386_v60, %v2139_v29  ;;  %v1506_v35 = vadd.f32 %v1652_v27, %v1489_v26 }
 0x16f   :  { %v378_v5 = vcombine.high %v376_v2, %v376_v2  ;;  %v421_v8 = vcombine.low %v377_v3, %v376_v2  ;;  %v428_v13 = vrot.slane %v420_v47, %v2139_v29 }
 0x170   :  { %v1495_v12 = vrot.slane %v1494_v4, 2  ;;  %v463_v15 = vmax.f32 %v461_v7, %v462_v9  ;;  %v1508_v41 = vmax.f32 %v1506_v35, 0.0 }
 0x171   :  { %v435_v54 = vrot.slane %v421_v8, %v2139_v29  ;;  %v437_v14 = vcombine.low %v378_v5, %v385_v53 }
 0x172   :  { %v1496_v18 = vmax.f32 %v1494_v4, %v1495_v12  ;;  %v464_v23 = vrot.slane %v463_v15, 2 }
 0x173   :  { %v436_v20 = vcombine.low %v428_v13, %v435_v54  ;;  %v444_v21 = vrot.slane %v437_v14, %v2139_v29 }
 0x174   :  { %v1497_v24 = vrot.slane %v1496_v18, 1  ;;  %v465_v34 = vmax.f32 %v463_v15, %v464_v23 }
 0x175   :  { %v452_v25 = vcombine.low %v444_v21, %v451_v10  ;;  %v468_v31 = vsel %vm457_vm7, %v436_v20, -inf }
 0x176   :  { %v1498_v33 = vmax.f32 %v1496_v18, %v1497_v24  ;;  %v466_v39 = vrot.slane %v465_v34, 1 }
 0x177   :  { %v469_v29 = vsel %vm459_vm9, %v452_v25, -inf }
 0x178   :  { %v470_v19 = vmax.f32 %v468_v31, %v469_v29  ;;  %v1507_v36 = vadd.f32 %v1652_v27, %v1498_v33  ;;  %v467_v32 = vmax.f32 %v465_v34, %v466_v39 }
 0x17a   :  { %v471_v37 = vrot.slane %v470_v19, 4  ;;  %v1509_v38 = vmax.f32 %v1507_v36, 0.0  ;;  %v2328_v11 = vadd.f32 %v2322_v42, %v467_v32 }
 0x17c   :  { %v472_v40 = vmax.f32 %v470_v19, %v471_v37  ;;  %v1525_v43 = vrot.slane %v1509_v38, 7 }
 0x17e   :  { %v1759_v0 = vpop.f32.mrb[4].mxu1  ;;  %v1526_v44 = vsel %vm1513_vm10, %v1525_v43, %v1508_v41  ;;  %v473_v48 = vrot.slane %v472_v40, 2 }
 0x17f   :  { %v1011_v1 = vcombine.high %v1759_v0, %v1759_v0  ;;  %v1018_v45 = vrot.slane %v1759_v0, %v2153_v49  ;;  %v939_v46 = vpop.f32.mrb[5].mxu1  ;;  %1527 = vrot.lane.b32.xlu1 %v1526_v44, %s1903_s6 }
 0x180   :  { %v962_v50 = vcombine.high %v939_v46, %v939_v46  ;;  %v969_v52 = vrot.slane %v939_v46, %v2153_v49  ;;  %v474_v7 = vmax.f32 %v472_v40, %v473_v48 }
 0x181   :  { %v1025_v53 = vrot.slane %v1011_v1, %v2153_v49  ;;  %v1026_v55 = vcombine.high %v1018_v45, %v1018_v45  ;;  %v1034_v59 = vrot.slane %v1018_v45, %v2153_v49 }
 0x182   :  { %v976_v56 = vrot.slane %v962_v50, %v2153_v49  ;;  %v977_v57 = vcombine.high %v969_v52, %v969_v52  ;;  %v1762_v6 = vpop.f32.mrb[6].mxu1  ;;  %v985_v2 = vrot.slane %v969_v52, %v2153_v49  ;;  %v475_v24 = vrot.slane %v474_v7, 1 }
 0x183   :  { %v1027_v58 = vcombine.high %v1025_v53, %v1025_v53  ;;  %v1041_v60 = vrot.slane %v1025_v53, %v2153_v49  ;;  %v1048_v61 = vrot.slane %v1026_v55, %v2153_v49  ;;  %v949_v62 = vpop.f32.mrb[7].mxu1  ;;  %v1115_v8 = vrot.slane %v1762_v6, %v2153_v49 }
 0x184   :  { %v978_v63 = vcombine.high %v976_v56, %v976_v56  ;;  %v999_v3 = vrot.slane %v977_v57, %v2153_v49  ;;  %v992_v5 = vrot.slane %v976_v56, %v2153_v49  ;;  %v1060_v15 = vcombine.high %v949_v62, %v949_v62 }
 0x185   :  { %v1180_v47 = vcombine.low %v1034_v59, %v1048_v61  ;;  %v1643_v4 = vcombine.high %v1034_v59, %v1048_v61  ;;  %v1202_v9 = vrot.slane %v1041_v60, %v2153_v49  ;;  %v1055_v13 = vrot.slane %v1027_v58, %v2153_v49 }
 0x186   :  { %v1006_v51 = vrot.slane %v978_v63, %v2153_v49  ;;  %v1131_v10 = vcombine.low %v985_v2, %v999_v3  ;;  %v1641_v12 = vcombine.high %v985_v2, %v999_v3  ;;  %v1057_v16 = vcombine.high %v1041_v60, %v1041_v60 }
 0x187   :  { %v1188_v54 = vrot.slane %v1180_v47, %v2153_v49  ;;  %v1195_v14 = vrot.slane %v1643_v4, %v2153_v49  ;;  %v1116_v23 = vcombine.high %v1115_v8, %v1115_v8  ;;  %v1217_v25 = vrot.slane %v1202_v9, %v2153_v49 }
 0x188   :  { %v1133_v17 = vcombine.low %v992_v5, %v1006_v51  ;;  %v1642_v18 = vcombine.high %v992_v5, %v1006_v51  ;;  %v1141_v20 = vrot.slane %v1131_v10, %v2153_v49  ;;  %v1148_v22 = vrot.slane %v1641_v12, %v2153_v49 }
 0x189   :  { %v1203_v21 = vcombine.low %v1188_v54, %v1195_v14  ;;  %v1067_v30 = vrot.slane %v949_v62, %v2153_v49  ;;  %v1059_v33 = vcombine.high %v1055_v13, %v1055_v13  ;;  %v1074_v34 = vrot.slane %v1060_v15, %v2153_v49 }
 0x18a   :  { %v1155_v26 = vrot.slane %v1133_v17, %v2153_v49  ;;  %v1162_v27 = vrot.slane %v1642_v18, %v2153_v49  ;;  %v1163_v29 = vcombine.low %v1141_v20, %v1148_v22  ;;  %v1219_v19 = vcombine.low %v1055_v13, %v1057_v16 }
 0x18b   :  { %v1210_v31 = vrot.slane %v1203_v21, %v2153_v49  ;;  %v1075_v36 = vcombine.high %v1067_v30, %v1067_v30  ;;  %v1083_v37 = vrot.slane %v1067_v30, %v2153_v49  ;;  %v1123_v40 = vrot.slane %v1115_v8, %v2153_v49 }
 0x18c   :  { %v1164_v35 = vcombine.low %v1155_v26, %v1162_v27  ;;  %v1171_v39 = vrot.slane %v1163_v29, %v2153_v49  ;;  %v1076_v41 = vcombine.high %v1074_v34, %v1074_v34  ;;  %v1090_v0 = vrot.slane %v1074_v34, %v2153_v49 }
 0x18d   :  { %v1218_v38 = vcombine.low %v1210_v31, %v1217_v25  ;;  %v1097_v44 = vrot.slane %v1075_v36, %v2153_v49  ;;  %v1105_v32 = vcombine.high %v1083_v37, %v1083_v37  ;;  %v1130_v1 = vrot.slane %v1116_v23, %v2153_v49 }
 0x18e   :  { %v1178_v43 = vrot.slane %v1164_v35, %v2153_v49  ;;  %v1104_v45 = vrot.slane %v1076_v41, %v2153_v49  ;;  %v1220_v46 = vcombine.low %v1059_v33, %v1083_v37  ;;  %v476_v48 = vmax.f32 %v474_v7, %v475_v24 }
 0x18f   :  { %v1106_v52 = vcombine.high %v1090_v0, %v1090_v0  ;;  %v1107_v53 = vcombine.high %v1097_v44, %v1097_v44  ;;  %v1221_v55 = vcombine.low %v1097_v44, %v1105_v32  ;;  %v1229_v57 = vrot.slane %v1219_v19, %v2153_v49  ;;  %v1653_v44 = vld [vmem:[%s2405_s8] ss:$0 sm:$0xff] }
 0x190   :  { %v1179_v50 = vcombine.low %v1171_v39, %v1178_v43  ;;  %v1108_v56 = vcombine.high %v1104_v45, %v1104_v45  ;;  %v1236_v6 = vrot.slane %v1220_v46, %v2153_v49  ;;  %v485_v58 = vadd.f32 %v2322_v42, %v476_v48 }
 0x191   :  { %v1313_v59 = vsel %vm1312_vm11, %v1218_v38, -inf  ;;  %v1222_v60 = vcombine.low %v1107_v53, %v1090_v0  ;;  %v1268_v61 = vcombine.low %v1104_v45, %v1106_v52  ;;  %v1290_v47 = vrot.slane %v1130_v1, %v2153_v49 }
 0x192   :  { %v1311_v62 = vsel %vm457_vm7, %v1179_v50, -inf  ;;  %v1251_v63 = vcombine.low %v1229_v57, %v1236_v6  ;;  %v1269_v2 = vcombine.low %v1108_v56, %v1123_v40  ;;  %v487_v7 = vmax.f32 %v485_v58, 0.0 }
 0x193   :  { %v1314_v3 = vmax.f32 %v1311_v62, %v1313_v59  ;;  %v1243_v4 = vrot.slane %v1221_v55, %v2153_v49  ;;  %v1250_v5 = vrot.slane %v1222_v60, %v2153_v49  ;;  %v486_v8 = vmax.f32 %v2328_v11, 0.0 }
 0x194   :  { %v1276_v42 = vrot.slane %v1268_v61, %v2153_v49  ;;  %v1283_v9 = vrot.slane %v1269_v2, %v2153_v49  ;;  %v1512_v10 = vrot.slane %v487_v7, 7  ;;  %v1259_v14 = vrot.slane %v1251_v63, %v2153_v49 }
 0x195   :  { %v1315_v51 = vrot.slane %v1314_v3, 4  ;;  %v1252_v12 = vcombine.low %v1243_v4, %v1250_v5  ;;  %v1305_v17 = vrot.slane %v1290_v47, %v2153_v49 }
 0x196   :  { %v1291_v13 = vcombine.low %v1276_v42, %v1283_v9  ;;  %v1514_v54 = vsel %vm1513_vm10, %v1512_v10, %v486_v8 }
 0x197   :  { %v1266_v15 = vrot.slane %v1252_v12, %v2153_v49  ;;  %v1316_v16 = vmax.f32 %v1314_v3, %v1315_v51 }
 0x198   :  { %v1298_v18 = vrot.slane %v1291_v13, %v2153_v49  ;;  %v1644_v49 = vld [vmem:[%s2401_s4] ss:$0 sm:$0xff] }
 0x199   :  { %v1267_v11 = vcombine.low %v1259_v14, %v1266_v15  ;;  %v1317_v21 = vrot.slane %v1316_v16, 2 }
 0x19a   :  { %v1306_v20 = vcombine.low %v1298_v18, %v1305_v17 }
 0x19b   :  { %v1321_v22 = vsel %vm457_vm7, %v1267_v11, -inf  ;;  %v1318_v25 = vmax.f32 %v1316_v16, %v1317_v21 }
 0x19c   :  { %v1322_v23 = vsel %vm1312_vm11, %v1306_v20, -inf }
 0x19d   :  { %v1323_v24 = vmax.f32 %v1321_v22, %v1322_v23  ;;  %v1319_v30 = vrot.slane %v1318_v25, 1 }
 0x19f   :  { %v1324_v26 = vrot.slane %v1323_v24, 4  ;;  %v1320_v33 = vmax.f32 %v1318_v25, %v1319_v30 }
 0x1a1   :  { %v1325_v27 = vmax.f32 %v1323_v24, %v1324_v26  ;;  %v1337_v35 = vadd.f32 %v1644_v49, %v1320_v33 }
 0x1a3   :  { %v1326_v31 = vrot.slane %v1325_v27, 2  ;;  %v1339_v38 = vmax.f32 %v1337_v35, 0.0 }
 0x1a5   :  { %v1327_v29 = vmax.f32 %v1325_v27, %v1326_v31 }
 0x1a7   :  { %v1328_v34 = vrot.slane %v1327_v29, 1 }
 0x1a9   :  { %v1329_v19 = vmax.f32 %v1327_v29, %v1328_v34 }
 0x1ab   :  { %v1338_v36 = vadd.f32 %v1644_v49, %v1329_v19 }
 0x1ad   :  { %v1340_v37 = vmax.f32 %v1338_v36, 0.0 }
 0x1af   :  { %v1518_v39 = vrot.slane %v1340_v37, 7 }
 0x1b1   :  { %v1519_v40 = vsel %vm1513_vm10, %v1518_v39, %v1339_v38 }
 0x1b2   :  { %1520 = vrot.lane.b32.xlu0 %v1519_v40, %s1905_s12 }
 0x1f1   :  { %v1528_v43 = vpop.permute.xlu1 %1527 }
 0x224   :  { %v1521_v41 = vpop.permute.xlu0 %1520 }
 0x225   :  { %v1530_v28 = vsel %vm457_vm7, %v1514_v54, %v1521_v41 }
 0x226   :  { %v1532_v0 = vsel %vm1531_vm13, %v1530_v28, %v1528_v43 }
 0x227   :  { %1770 = vmatmul.mubr.msk.f32.vlgmr.msra.gmra.mrb[6].mxu0 %vm1543_vm14, %v1532_v0 }
 0x2fa   :  { %v1613_v32 = vpop.f32.mrb[6].mxu0 }
 0x2fb   :  { %v1614_v1 = vadd.f32 %v1653_v44, %v1613_v32  ;;  %v1771_v45 = vpop.f32.mrb[7].mxu0 }
 0x2fd   :  { %1618 = vst.msk [vmem:[#allocation2] sm:$0x3] %vm1617_vm15, %v1614_v1 }
 0x2fe   :  { %1883 = shalt.err (!%p1880_p4)
}
 0x2ff   :  { %s1884_s20 = scalar_lea.hbm %s2406_s9, 32 }
 0x300   :  { %p1885_p5 = scmp.ne.s32.totalorder %s2406_s9, %s1884_s20  ;;  %p1888_p6 = scmp.lt.u32.totalorder %s1884_s20, %s2406_s9 }
 0x302   :  { %p1890_p7 = pnand %p1888_p6, %p1885_p5 }
 0x304   :  { %1893 = shalt.err (!%p1890_p7)
}
 0x305   :  { %1628 = dma.vmem_to_hbm [thread:$0]  %s1626_s15, 32, %s2406_s9, [#allocation3]  }
 0x306   :  { %1894 = dma.done.wait [#allocation3], 32  }
 0x307   :  { %1895 = vsyncadd [#allocation3], 4294967264 }
 0x308   :  { %1632 = vsyncpa [#allocation3], 1 }

</bundles_post_ra>
